<compile_context>
chip_gen: v7x
topology: tpu7x:2x2x1
jax: 0.10.0
libtpu: 0.0.40
codegen_flags: <defaults>
</compile_context>

<pallas_src>
import math

import jax
import jax.numpy as jnp
from jax.experimental import pallas as pl
from jax.experimental.pallas import tpu as pltpu


def _create_positional_encoding(channels: int, height: int, width: int) -> jnp.ndarray:
    """Replicates PositionalEncoding2D.create_positional_encoding exactly.

    pe[0, c,   y, x] = sin(x * exp(c * -ln(10000)/channels))   for even c
    pe[0, c+1, y, x] = cos(y * exp(c * -ln(10000)/channels))   if c+1 < channels
    """
    c_even = jnp.arange(0, channels, 2, dtype=jnp.float32)           # even channel indices
    div_term = jnp.exp(c_even * (-math.log(10000.0) / channels))     # (ceil(C/2),)

    xs = jnp.arange(width, dtype=jnp.float32)                         # (W,)
    ys = jnp.arange(height, dtype=jnp.float32)                        # (H,)

    # sin(x * div_term): (ceil(C/2), 1, W) broadcast over H
    sin_part = jnp.broadcast_to(
        jnp.sin(div_term[:, None, None] * xs[None, None, :]),
        (c_even.shape[0], height, width),
    )
    # cos(y * div_term): (n_odd, H, 1) broadcast over W
    n_odd = channels // 2  # number of odd channels with c+1 < channels
    cos_part = jnp.broadcast_to(
        jnp.cos(div_term[:n_odd, None, None] * ys[None, :, None]),
        (n_odd, height, width),
    )

    pe = jnp.zeros((1, channels, height, width), dtype=jnp.float32)
    pe = pe.at[0, 0::2, :, :].set(sin_part)
    pe = pe.at[0, 1::2, :, :].set(cos_part)
    return pe


def _add_pe_kernel(x_ref, pe_ref, o_ref):
    # x_ref: (1, TC, TW) tile of one batch element; pe_ref: matching
    # batch-invariant tile. Promote-add-cast so bf16 activations store cleanly.
    o_ref[...] = (x_ref[...] + pe_ref[...]).astype(o_ref.dtype)


def _chip_budget() -> tuple[int, int]:
    """(max_block_bytes, max_lane_tile) tuned per TPU generation."""
    try:
        kind = jax.devices()[0].device_kind.lower()
    except Exception:  # pragma: no cover - conservative fallback
        kind = ""
    if "v5 lite" in kind or "v5e" in kind or "v5litepod" in kind:
        # v5e: 16 MiB scoped-VMEM default -> 2*3*2 MiB = 12 MiB of streams.
        return 2 << 20, 2048
    # v6e / v7x (and unknown): 2*3*4 MiB = 24 MiB fits the 32 MiB scoped
    # default and stays well under v7x's 64 MiB physical VMEM per TensorCore.
    return 4 << 20, 4096


def _choose_tiles(n: int, c: int, hw: int, itemsize: int) -> tuple[int, int]:
    """Pick (channel_tile, lane_tile) for the flattened (N, C, H*W) layout."""
    max_block_bytes, max_lane_tile = _chip_budget()

    # Lane tile: full H*W if it fits, else a 128-aligned chunk.
    if hw <= max_lane_tile:
        tw = hw
    else:
        tw = (max_lane_tile // 128) * 128

    # Channel tile aligned to the dtype's sublane packing
    # (8 rows f32, 16 bf16, 32 int8/fp8).
    sublane = 8 * max(1, 4 // itemsize)
    max_rows = max(1, max_block_bytes // (tw * itemsize))
    if c <= max_rows:
        tc = c                                   # full-dim block (always legal)
    else:
        tc = max(sublane, (max_rows // sublane) * sublane)

    # v7x has 2 TensorCores: guarantee at least 2 blocks along a parallel axis.
    if n == 1 and pl.cdiv(c, tc) == 1 and pl.cdiv(hw, tw) == 1:
        if hw >= 256:
            tw = ((hw // 2 + 127) // 128) * 128  # split lanes, 128-aligned
        elif c >= 2 * sublane:
            tc = ((c // 2 + sublane - 1) // sublane) * sublane
        # else: tiny single-step tensor; second-TC idle time is negligible.
    return tc, tw


def positional_encoding_2d(x: jnp.ndarray, pe: jnp.ndarray,
                           donate_x: bool = False) -> jnp.ndarray:
    """x: (N, C, H, W), pe: (1, C, H, W) -> x + pe, broadcast over batch."""
    n, c, h, w = x.shape
    assert pe.shape == (1, c, h, w)
    hw = h * w

    # Lane-dense 3D view: last dim (H*W) maps onto the 128-wide lane axis.
    # NOTE: if H*W is not a multiple of 128 the last lane group is masked
    # (vst.msk); we accept that rather than paying an extra HBM pad copy.
    x3 = x.reshape(n, c, hw)
    # Stream pe in the activation dtype (values are in [-1, 1]); for f32
    # activations this is a no-op and matches the PyTorch f32 table exactly.
    pe3 = pe.reshape(1, c, hw).astype(x.dtype)

    itemsize = jnp.dtype(x.dtype).itemsize
    tc, tw = _choose_tiles(n, c, hw, itemsize)

    # Batch axis innermost: the pe block index (0, j, k) is constant across
    # consecutive iterations, so Pallas fetches each pe tile once, not N times.
    grid = (pl.cdiv(c, tc), pl.cdiv(hw, tw), n)

    block_bytes = tc * tw * itemsize
    # 2 buffers x 3 streams per block, plus headroom; 32 MiB floor is legal on
    # every generation (v5e/v6e: 128 MiB physical, v7x: 64 MiB), cap at 48 MiB.
    vmem_limit = min(48 << 20, max(32 << 20, 6 * block_bytes + (4 << 20)))

    out3 = pl.pallas_call(
        _add_pe_kernel,
        out_shape=jax.ShapeDtypeStruct((n, c, hw), x.dtype),
        grid_spec=pl.GridSpec(
            grid=grid,
            in_specs=[
                # x: one (batch, channel-chunk, lane-chunk) tile per grid step.
                pl.BlockSpec((1, tc, tw), lambda j, k, i: (i, j, k)),
                # pe: same tile, batch-invariant (reused across the inner N axis).
                pl.BlockSpec((1, tc, tw), lambda j, k, i: (0, j, k)),
            ],
            out_specs=pl.BlockSpec((1, tc, tw), lambda j, k, i: (i, j, k)),
        ),
        compiler_params=pltpu.CompilerParams(
            # Pure elementwise: every axis is independent -> megacore-shardable.
            dimension_semantics=("parallel", "parallel", "parallel"),
            vmem_limit_bytes=int(vmem_limit),
        ),
        # In-place-safe add; only donate when the caller no longer needs x.
        input_output_aliases=({0: 0} if donate_x else {}),
    )(x3, pe3)

    return out3.reshape(n, c, h, w)


if __name__ == "__main__":
    # Small shapes consistent with the module's pos_enc usage (channels, H/2, W/2),
    # scaled down for the smoke test.
    N, C, H, W = 2, 4, 16, 16

    key = jax.random.PRNGKey(0)
    x = jax.random.normal(key, (N, C, H, W), dtype=jnp.float32)

    pe = _create_positional_encoding(C, H, W)

    out = positional_encoding_2d(x, pe)
    out = jax.block_until_ready(out)

    # Sanity check against the pure-JAX reference (same broadcast add).
    ref = x + pe
    assert out.shape == (N, C, H, W)
    assert jnp.allclose(out, ref, atol=1e-6), "mismatch vs reference"

    # TODO(synk): conv stem / MixCFNPlus (spectral-norm conv, depthwise convs,
    # SE, BatchNorm, GELU, Dropout) / bilinear upsampling / GaussianNoise of
    # MeViTPlus are standard XLA-friendly ops; only the PositionalEncoding2D
    # hot path is implemented as a Pallas kernel here.
    print("KERNEL_OK")
</pallas_src>

<mosaic_0001>
module attributes {stable_mosaic.version = 11 : i64} {
  func.func @_add_pe_kernel(%arg0: i32, %arg1: i32, %arg2: i32, %arg3: memref<1x4x256xf32, #tpu.memory_space<vmem>>, %arg4: memref<1x4x256xf32, #tpu.memory_space<vmem>>, %arg5: memref<1x4x256xf32, #tpu.memory_space<vmem>>) attributes {dimension_semantics = [#tpu.dimension_semantics<parallel>, #tpu.dimension_semantics<parallel>, #tpu.dimension_semantics<parallel>], iteration_bounds = array<i64: 1, 1, 2>, scalar_prefetch = 0 : i64, scratch_operands = 0 : i64, tpu.core_type = #tpu.core_type<tc>, window_params = [{transform_indices = @transform_0, window_bounds = array<i64: 1, 4, 256>}, {transform_indices = @transform_1, window_bounds = array<i64: 1, 4, 256>}, {transform_indices = @transform_2, window_bounds = array<i64: 1, 4, 256>}]} {
    %c0 = arith.constant 0 : index
    %c0_0 = arith.constant 0 : index
    %c0_1 = arith.constant 0 : index
    %0 = vector.load %arg3[%c0, %c0_0, %c0_1] : memref<1x4x256xf32, #tpu.memory_space<vmem>>, vector<1x4x256xf32>
    %c0_2 = arith.constant 0 : index
    %c0_3 = arith.constant 0 : index
    %c0_4 = arith.constant 0 : index
    %1 = vector.load %arg4[%c0_2, %c0_3, %c0_4] : memref<1x4x256xf32, #tpu.memory_space<vmem>>, vector<1x4x256xf32>
    %2 = arith.addf %0, %1 : vector<1x4x256xf32>
    %c0_5 = arith.constant 0 : index
    %c0_6 = arith.constant 0 : index
    %c0_7 = arith.constant 0 : index
    %3 = vector.load %arg5[%c0_5, %c0_6, %c0_7] : memref<1x4x256xf32, #tpu.memory_space<vmem>>, vector<1x4x256xf32>
    tpu.vector_store %arg5[%c0_5, %c0_6, %c0_7], %2 {strides = array<i32>} : memref<1x4x256xf32, #tpu.memory_space<vmem>>, vector<1x4x256xf32>,
    return
  }
  func.func @transform_0(%arg0: i32, %arg1: i32, %arg2: i32) -> (i32, i32, i32) {
    %c0_i32 = arith.constant 0 : i32
    return %arg2, %arg0, %arg1 : i32, i32, i32
  }
  func.func @transform_1(%arg0: i32, %arg1: i32, %arg2: i32) -> (i32, i32, i32) {
    %c0_i32 = arith.constant 0 : i32
    %c0_i32_0 = arith.constant 0 : i32
    return %c0_i32, %arg0, %arg1 : i32, i32, i32
  }
  func.func @transform_2(%arg0: i32, %arg1: i32, %arg2: i32) -> (i32, i32, i32) {
    %c0_i32 = arith.constant 0 : i32
    return %arg2, %arg0, %arg1 : i32, i32, i32
  }
}

</mosaic_0001>

<bundles_post_ra>
// kernel: tpu_custom_call.1
= control target key start
LH: loop header
LB: loop body
LE: loop exit
PB: predicated region body
PF: predicated region fallthrough
CT: control target
= control target key end

     0   :  { %7 = vsyncpa [#allocation3], 0  ;;  %s820_s0 = inlined_call_operand.hbm [shape: f32[2,4,256], index: 0, kind: input, shape index: {}]   ;;  %s821_s1 = inlined_call_operand.hbm [shape: f32[1,4,256], index: 1, kind: input, shape index: {}]   ;;  %s822_s2 = inlined_call_operand.hbm [shape: f32[2,4,256], index: 2, kind: output, shape index: {}]  }
   0x1   :  { %9 = vsyncpa [#allocation3 + $0x1], 0 }
   0x2   :  { %10 = vsyncpa [#allocation6], 0 }
   0x3   :  { %11 = vsyncpa [#allocation4], 0 }
   0x4   :  { %13 = vsyncpa [#allocation4 + $0x1], 0  ;;  %s604_s9 = smov 0   ;;  %s606_s10 = smov 0  }
   0x5   :  { %s608_s11 = smov 0   ;;  %s610_s12 = smov 0  }
   0x6   :  { %s612_s13 = smov 0   ;;  %s614_s14 = smov 0  }
   0x7 LB: > { %s348_s15 = sadd.s32 4294967295, %s584_s14   ;;  %s349_s16 = sadd.s32 4294967294, %s584_s14   ;;  %s584_s14 = sphi %s614_s14, %s19_s14   ;;  %s580_s13 = sphi %s612_s13, %s847_s13   ;;  %s576_s12 = sphi %s610_s12, %s846_s12   ;;  %s572_s11 = sphi %s608_s11, %s845_s11   ;;  %s568_s10 = sphi %s606_s10, %s844_s10   ;;  %s564_s9 = sphi %s604_s9, %s843_s9  }
   0x8   : > { %p62_p0 = scmp.ne.s32.totalorder %s568_s10, %s564_s9  ;;  %p638_p1 = scmp.eq.s32.totalorder %s348_s15, 0 }
   0x9   : > { %p642_p2 = scmp.eq.s32.totalorder %s348_s15, 1  ;;  %p124_p3 = scmp.eq.s32.totalorder %s349_s16, 1 }
   0xa   : > { %s827_s17 = scalar_select %p638_p1, 1, 0 }
   0xb   : > { %s828_s18 = scalar_select %p642_p2, 1, 0 }
   0xc   : > { %p648_p4 = por %p638_p1, %p62_p0  ;;  %p350_p5 = scmp.ge.s32.totalorder %s584_s14, 1 }
   0xd   : > { %p653_p6 = por %p124_p3, %p62_p0  ;;  %p131_p7 = scmp.lt.s32.totalorder %s584_s14, 3 }
   0xe   : > { %s829_s19 = scalar_select %p648_p4, 1, 0 }
   0xf   : > { %s830_s20 = scalar_select %p653_p6, 1, 0 }
  0x10   : > { %p658_p8 = pnand %p350_p5, %p131_p7  ;;  %s586_s22 = smov [#allocation5]  }
  0x11   : > { %s149_s23 = sshll.u32 %s586_s22, 4  ;;  %s31_s25 = sadd.s32 1, %s580_s13  ;;  %s150_s23 = int_to_ptr.vmem [resolvable:$true] %s149_s23 }
  0x12   : > { %s831_s21 = scalar_select %p658_p8, 1, 0 }
  0x13   : > { %p375_p10 = pneg %p658_p8  ;;  %s49_s26 = sadd.s32 1, %s572_s11 }
  0x14   : > { %p673_p12 = scmp.ge.s32.totalorder %s31_s25, 2  ;;  %s440_s30 = scalar_lea.hbm %s821_s1, 128 }
  0x15   : > { %p667_p11 = pnand %p375_p10, %p638_p1  ;;  %p441_p13 = scmp.ne.s32.totalorder %s821_s1, %s440_s30 }
  0x16   : > { %s833_s27 = scalar_select %p673_p12, 1, 0 }
  0x17   : > { %p442_p0 = pneg %p667_p11  ;;  %p447_p7 = scmp.lt.u32.totalorder %s440_s30, %s821_s1 }
  0x19   : > { %p443_p3 = pnand %p442_p0, %p441_p13 }
  0x1b   : > { %p444_p5 = pneg %p443_p3 }
  0x1d   : > { %p449_p10 = pnand %p447_p7, %p444_p5 }
  0x1f   : > { %452 = shalt.err (!%p449_p10)
}
  0x20   : > { %s453_s7 = scalar_lea.vmem %s150_s23, 128  ;;  %p461_p4 = scmp.lt.s32.totalorder %s150_s23, %s150_s23 }
  0x21   : > { %p454_p9 = scmp.ne.s32.totalorder %s150_s23, %s453_s7  ;;  %p462_p8 = scmp.lt.s32.totalorder %s453_s7, %s453_s7 }
  0x23   : > { %p456_p6 = pnand %p454_p9, %p442_p0  ;;  %p463_p2 = por %p462_p8, %p461_p4 }
  0x25   : > { %p457_p1 = pneg %p456_p6 }
  0x27   : > { %p464_p12 = pnand %p463_p2, %p457_p1 }
  0x29   : > { %467 = shalt.err (!%p464_p12)
}
  0x2a   : > { %378 = dma.hbm_to_vmem [thread:$0]  (!%p667_p11), %s821_s1, 128, %s150_s23, [#allocation6]  }
  0x2b   : > { %p834_p4 = scmp.ne.s32.totalorder %s833_s27, 0  ;;  %p56_p1 = scmp.ne.s32.totalorder %s572_s11, %s568_s10 }
  0x2c   : > { %p57_p2 = scmp.eq.s32.totalorder %s584_s14, 0  ;;  %p388_p6 = scmp.lt.s32.totalorder %s584_s14, 2 }
  0x2d   : > { %s849_s25 = smov (%p834_p4, %s31_s25), 0  ;;  %p835_p12 = scmp.ne.s32.totalorder %s828_s18, 0 }
  0x2e   : > { %s42_s16 = ssub.s32 %s580_s13, %s849_s25  ;;  %p58_p9 = por %p57_p2, %p56_p1 }
  0x2f   : > { %p47_p8 = scmp.eq.s32.totalorder %s42_s16, 0  ;;  %p705_p13 = por %p835_p12, %p56_p1 }
  0x30   : > { %s160_s24 = sand.u32 1, %s572_s11   ;;  %s365_s27 = sshll.u32 %s580_s13, 7 }
  0x31   : > { %s713_s28 = scalar_select %p47_p8, %s572_s11, %s49_s26  }
  0x32   : > { %s353_s23 = sshll.u32 %s160_s24, 3  ;;  %s719_s3 = scalar_lea.hbm %s820_s0, %s365_s27 }
  0x33   : > { %s164_s18 = scalar_lea.vmem [#allocation2], %s353_s23  ;;  %p723_p11 = pnand %p388_p6, %p58_p9 }
  0x34   : > { %s176_s4 = sshll.u32 %s164_s18, 4  ;;  %s161_s26 = scalar_lea.sflag [#allocation3], %s160_s24  ;;  %s721_s4 = int_to_ptr.vmem [resolvable:$true] %s176_s4 }
  0x35   : > { %s468_s6 = scalar_lea.hbm %s719_s3, 128  ;;  %p470_p3 = pneg %p723_p11 }
  0x36   : > { %p469_p0 = scmp.ne.s32.totalorder %s719_s3, %s468_s6  ;;  %s473_s15 = scalar_lea.hbm %s820_s0, 256 }
  0x37   : > { %p474_p10 = scmp.lt.u32.totalorder %s719_s3, %s820_s0  ;;  %p475_p4 = scmp.lt.u32.totalorder %s473_s15, %s468_s6 }
  0x38   : > { %p471_p5 = pnand %p470_p3, %p469_p0  ;;  %p477_p2 = scmp.lt.u32.totalorder %s468_s6, %s719_s3 }
  0x39   : > { %p476_p1 = por %p475_p4, %p474_p10 }
  0x3a   : > { %p472_p7 = pneg %p471_p5 }
  0x3b   : > { %p478_p6 = por %p477_p2, %p476_p1 }
  0x3d   : > { %p479_p8 = pnand %p478_p6, %p472_p7 }
  0x3f   : > { %482 = shalt.err (!%p479_p8)
}
  0x40   : > { %s483_s24 = scalar_lea.vmem %s721_s4, 128  ;;  %s587_s27 = smov [#allocation2]  }
  0x41   : > { %p484_p9 = scmp.ne.s32.totalorder %s721_s4, %s483_s24  ;;  %s488_s29 = sshll.u32 %s587_s27, 4  ;;  %s489_s29 = int_to_ptr.vmem [resolvable:$false] %s488_s29 }
  0x42   : > { %s490_s30 = scalar_lea.vmem %s489_s29, 256  ;;  %p491_p5 = scmp.lt.s32.totalorder %s721_s4, %s489_s29 }
  0x43   : > { %p486_p12 = pnand %p484_p9, %p470_p3  ;;  %p492_p10 = scmp.lt.s32.totalorder %s490_s30, %s483_s24 }
  0x45   : > { %p487_p0 = pneg %p486_p12  ;;  %p493_p4 = por %p492_p10, %p491_p5 }
  0x47   : > { %p494_p1 = pnand %p493_p4, %p487_p0 }
  0x49   : > { %497 = shalt.err (!%p494_p1)
}
  0x4a   : > { %382 = dma.hbm_to_vmem [thread:$0]  (!%p723_p11), %s719_s3, 128, %s721_s4, %s161_s26  }
  0x4b   : > { %p838_p7 = scmp.ne.s32.totalorder %s831_s21, 0 }
  0x4c   : > { %s755_s18 = sand.u32 (!%p838_p7), 1, %s568_s10   ;;  %p839_p3 = scmp.ne.s32.totalorder (!%p838_p7), %s829_s19, 0 }
  0x4d   : > { %185 = sbr.rel (%p838_p7) target bundleno = 113 (0x71), region = 28  ;;  %s357_s6 = sshll.u32 (!%p838_p7), %s755_s18, 3 }
  0x4e   : > { %s188_s7 = scalar_lea.sflag (!%p838_p7), [#allocation3], %s755_s18  ;;  %s191_s8 = scalar_lea.vmem (!%p838_p7), [#allocation2], %s357_s6 }
  0x54   : > { %551 = dma.done.wait (%p839_p3), %s188_s7, 128  }
  0x55   : > { %553 = vsyncadd (%p839_p3), %s188_s7, 4294967168  ;;  %p840_p2 = scmp.ne.s32.totalorder %s827_s17, 0 }
  0x57   : > { %555 = dma.done.wait (%p840_p2), [#allocation6], 128  }
  0x58   : > { %557 = vsyncadd (%p840_p2), [#allocation6], 4294967168  ;;  %s215_s21 = scalar_lea.vmem [#allocation7], %s357_s6  ;;  %s366_s4 = sshll.u32 %s576_s12, 7  ;;  %v219_v0 = vld [vmem:[%s191_s8] sm:$0xff]  ;;  %v220_v1 = vld [vmem:[#allocation5] sm:$0xff] }
  0x59   : > { %s242_s3 = sshll.u32 %s215_s21, 4  ;;  %v221_v2 = vadd.f32 %v220_v1, %v219_v0  ;;  %s773_s26 = scalar_lea.hbm %s822_s2, %s366_s4  ;;  %s768_s3 = int_to_ptr.vmem [resolvable:$true] %s242_s3 }
  0x5a   : > { %s224_s17 = scalar_lea.sflag [#allocation4], %s755_s18  ;;  %s498_s15 = scalar_lea.vmem %s768_s3, 128 }
  0x5b   : > { %222 = vst [vmem:[%s215_s21] sm:$0xff] %v221_v2  ;;  %p499_p11 = scmp.ne.s32.totalorder %s768_s3, %s498_s15  ;;  %s588_s12 = smov [#allocation7]  }
  0x5c   : > { %s502_s16 = sshll.u32 %s588_s12, 4  ;;  %s503_s16 = int_to_ptr.vmem [resolvable:$false] %s502_s16 }
  0x5d   : > { %p500_p6 = pnand %p499_p11, %p705_p13  ;;  %s504_s23 = scalar_lea.vmem %s503_s16, 256 }
  0x5e   : > { %p505_p9 = scmp.lt.s32.totalorder %s768_s3, %s503_s16  ;;  %p506_p12 = scmp.lt.s32.totalorder %s504_s23, %s498_s15 }
  0x5f   : > { %p501_p8 = pneg %p500_p6 }
  0x60   : > { %p507_p0 = por %p506_p12, %p505_p9 }
  0x62   : > { %p508_p5 = pnand %p507_p0, %p501_p8 }
  0x64   : > { %511 = shalt.err (!%p508_p5)
}
  0x65   : > { %s512_s24 = scalar_lea.hbm %s773_s26, 128  ;;  %s516_s30 = scalar_lea.hbm %s822_s2, 256 }
  0x66   : > { %p513_p10 = scmp.ne.s32.totalorder %s773_s26, %s512_s24  ;;  %p517_p7 = scmp.lt.u32.totalorder %s773_s26, %s822_s2 }
  0x67   : > { %p518_p3 = scmp.lt.u32.totalorder %s516_s30, %s512_s24  ;;  %p520_p11 = scmp.lt.u32.totalorder %s512_s24, %s773_s26 }
  0x68   : > { %p514_p4 = pnand %p513_p10, %p705_p13 }
  0x69   : > { %p519_p2 = por %p518_p3, %p517_p7 }
  0x6a   : > { %p515_p1 = pneg %p514_p4 }
  0x6b   : > { %p521_p6 = por %p520_p11, %p519_p2 }
  0x6d   : > { %p522_p8 = pnand %p521_p6, %p515_p1 }
  0x6f   : > { %525 = shalt.err (!%p522_p8)
}
  0x70   : > { %373 = dma.vmem_to_hbm [thread:$0]  (%p705_p13), %s768_s3, 128, %s773_s26, %s224_s17  }
  0x71 PF: > { %s254_s7 = sand.u32 1, %s564_s9   ;;  %p841_p9 = scmp.ne.s32.totalorder %s830_s20, 0 }
  0x72   : > { %p842_p12 = scmp.ge.s32.totalorder %s584_s14, 2  ;;  %s255_s8 = scalar_lea.sflag [#allocation4], %s254_s7 }
  0x74   : > { %p384_p0 = pnand %p842_p12, %p841_p9 }
  0x76   : > { %559 = dma.done.wait (!%p384_p0), %s255_s8, 128  }
  0x77   : > { %561 = vsyncadd (!%p384_p0), %s255_s8, 4294967168  ;;  %s19_s14 = sadd.s32 1, %s584_s14   ;;  %s843_s9 = smov %s568_s10 }
  0x78   : > { %p16_p5 = scmp.ge.s32.totalorder %s19_s14, 4   ;;  %s844_s10 = smov %s572_s11 }
  0x79   : > { %s845_s11 = smov %s713_s28  ;;  %s846_s12 = smov %s580_s13 }
  0x7a   : > { %s847_s13 = smov %s849_s25  ;;  %18 = sbr.rel (!%p16_p5) target bundleno = 7 (0x7), region = 78 }
  0x81   :  { %260 = vsyncpa [#allocation3], 1 }
  0x82   :  { %262 = vsyncpa [#allocation3 + $0x1], 1 }
  0x83   :  { %263 = vsyncpa [#allocation6], 1 }
  0x84   :  { %264 = vsyncpa [#allocation4], 1 }
  0x85   :  { %266 = vsyncpa [#allocation4 + $0x1], 1 }

</bundles_post_ra>
